<compile_context>
chip_gen: v7x
topology: tpu7x:2x2x1
jax: 0.10.0
libtpu: 0.0.40
codegen_flags: <defaults>
</compile_context>

<pallas_src>
import functools

import jax
import jax.numpy as jnp
from jax import lax
from jax.experimental import pallas as pl
from jax.experimental.pallas import tpu as pltpu


# ----------------------------------------------------------------------------
# Pallas kernel: one grid step == TB batch elements.
# ----------------------------------------------------------------------------
def ec_kernel(e_ref, y_ref, sim_ref, wpack_ref, w2_ref, o_ref, *,
              fuse_conv2, dense_out):
    # e_ref     : (TB, 1, F)   evidence feature per batch element
    # y_ref     : (TB, N, F)   claim token features
    # sim_ref   : (2, 1, F)    rows = [v_e, v_c]  (folded e/c/ec linears)
    # wpack_ref : (5, 1, C)    rows = [w1_cs, w1_es, w1_cos, b1_eff, b2]
    # w2_ref    : (C, 3C) if fuse_conv2 else (3, C, C)   (3x3-conv mid column)
    # o_ref     : (TB, 1, N*C) if dense_out else (TB, N, C)
    TB, N, F = y_ref.shape
    C = wpack_ref.shape[-1]
    TBN = TB * N
    eps = 1e-8

    y = y_ref[...].astype(jnp.float32)                     # (TB, N, F)
    e = e_ref[...].astype(jnp.float32)                     # (TB, 1, F)
    sims = sim_ref[...]                                    # (2, 1, F)
    v_e, v_c = sims[0:1], sims[1:2]                        # (1, 1, F)

    # ---- similarity stage: VPU multiplies + lane reductions, EUP rsqrt -----
    # x-side reductions use the un-broadcast e tile; results broadcast as
    # per-batch scalars (removes 2 full (TBN,F) multiplies + reductions).
    es3 = jnp.sum(y * e,   axis=-1, keepdims=True)         # y.x      (TB,N,1)
    y2  = jnp.sum(y * y,   axis=-1, keepdims=True)         # ||y||^2  (TB,N,1)
    ycv = jnp.sum(y * v_c, axis=-1, keepdims=True)         # y.v_c    (TB,N,1)
    x2  = jnp.sum(e * e,   axis=-1, keepdims=True)         # ||x||^2  (TB,1,1)
    xve = jnp.sum(e * v_e, axis=-1, keepdims=True)         # x.v_e    (TB,1,1)

    cos3 = xve + ycv                  # ec_linear bias is folded into b1_eff
    cs3 = es3 * lax.rsqrt(jnp.maximum(x2 * y2, eps * eps))  # cosine similarity

    # ---- Conv2d(3, C, 1x1) as broadcast FMAs + LeakyReLU(0.1) --------------
    wp = wpack_ref[...]                                    # (5, 1, C)
    w1_cs, w1_es, w1_cos = wp[0:1], wp[1:2], wp[2:3]       # (1, 1, C) each
    b1_eff = wp[3:4]                                       # (1, 1, C)
    b2 = wp[4]                                             # (1, C)

    h3 = cs3 * w1_cs + es3 * w1_es + cos3 * w1_cos + b1_eff          # (TB,N,C)
    h3 = jnp.where(h3 > 0, h3, 0.1 * h3)
    h = h3.reshape(TBN, C)

    # ---- Conv2d(C, C, 3x3, pad=1), width == 1 -> 3-tap conv along N --------
    # Row shifts are XLU sublane rolls; rows that would read across a batch
    # boundary are exactly the zero-padded rows of the conv -> mask them.
    nid = lax.broadcasted_iota(jnp.int32, (TB, N, 1), 1).reshape(TBN, 1)

    if fuse_conv2:
        # One MXU push against [W0|W1|W2]; roll/mask commute with the
        # row-wise matmul, so shift the per-tap results instead of h.
        g = jnp.dot(h, w2_ref[...], preferred_element_type=jnp.float32)  # (TBN,3C)
        up   = jnp.where(nid == 0,     0.0, pltpu.roll(g[:, :C], 1, axis=0))
        mid  = g[:, C:2 * C]
        down = jnp.where(nid == N - 1, 0.0,
                         pltpu.roll(g[:, 2 * C:], TBN - 1, axis=0))
        out = up + mid + down + b2
    else:
        # Conservative (previously validated) path: shift h, three small dots.
        up   = jnp.where(nid == 0,     0.0, pltpu.roll(h, 1,       axis=0))
        down = jnp.where(nid == N - 1, 0.0, pltpu.roll(h, TBN - 1, axis=0))
        out = (jnp.dot(up,   w2_ref[0], preferred_element_type=jnp.float32)
               + jnp.dot(h,    w2_ref[1], preferred_element_type=jnp.float32)
               + jnp.dot(down, w2_ref[2], preferred_element_type=jnp.float32)
               + b2)
    out = jnp.where(out > 0, out, 0.1 * out)

    if dense_out:
        o_ref[...] = out.reshape(TB, 1, N * C).astype(o_ref.dtype)
    else:
        o_ref[...] = out.reshape(TB, N, C).astype(o_ref.dtype)


# ----------------------------------------------------------------------------
# Tiling: largest batch tile that fits the double-buffered VMEM budget while
# keeping >= 2 grid steps (so the "parallel" axis can use both v7x TCs).
# ----------------------------------------------------------------------------
def _pick_tb(batch, n, f, c, *, in_bytes=4, vmem_budget_bytes=32 << 20):
    per_batch = 2 * ((n * f + f) * in_bytes + n * c * 4)   # 2x = double buffer
    fit_cap = max(1, vmem_budget_bytes // max(per_batch, 1))
    mc_cap = batch if batch < 2 else max(1, batch // 2)    # keep >= 2 steps
    cap = max(1, min(fit_cap, mc_cap))
    tb = 1
    for d in range(1, batch + 1):
        if batch % d == 0 and d <= cap:
            tb = d
    return tb


# ----------------------------------------------------------------------------
# Wrapper: algebraic folding, weight packing, pallas_call
# ----------------------------------------------------------------------------
def ec_feature_extract(e_fea, c_fea, p, *, tb=None, input_dtype=None,
                       dense_out=None, fuse_conv2=True, cfea_buffers=2):
    B, F = e_fea.shape
    _, N, _ = c_fea.shape
    H = p["We"].shape[0]
    C = p["W1"].shape[0]

    in_dtype = input_dtype if input_dtype is not None else c_fea.dtype
    in_bytes = jnp.dtype(in_dtype).itemsize
    if tb is None:
        tb = _pick_tb(B, N, F, C, in_bytes=in_bytes)
    assert B % tb == 0

    # --- fold e_linear / c_linear / ec_linear into two F-vectors + scalar ---
    wec_e = p["Wec"][0, :H]
    wec_c = p["Wec"][0, H:]
    v_e = jnp.sum(p["We"] * wec_e[:, None], axis=0)             # We^T wec_e
    v_c = jnp.sum(p["Wc"] * wec_c[:, None], axis=0)             # Wc^T wec_c
    bias_ec = (jnp.sum(p["be"] * wec_e) + jnp.sum(p["bc"] * wec_c)
               + p["bec"][0])
    sim_w = jnp.stack([v_e, v_c], axis=0).reshape(2, 1, F).astype(jnp.float32)

    # --- 1x1 conv weights per input channel [cs, es, cos]; fold bias_ec -----
    w1 = p["W1"][:, :, 0, 0]                                    # (C, 3)
    b1_eff = p["b1"] + bias_ec * w1[:, 2]
    wpack = jnp.stack([w1[:, 0], w1[:, 1], w1[:, 2], b1_eff, p["b2"]],
                      axis=0).reshape(5, 1, C).astype(jnp.float32)

    # --- middle width column of the 3x3 kernel ------------------------------
    w2_3 = jnp.transpose(p["W2"][:, :, :, 1], (2, 1, 0)).astype(jnp.float32)  # (3,C,C)
    w2f = jnp.concatenate([w2_3[0], w2_3[1], w2_3[2]], axis=1)                # (C,3C)

    e3 = e_fea.reshape(B, 1, F).astype(in_dtype)
    yc = c_fea.astype(in_dtype)

    if dense_out is None:
        # Lane-dense (tb, 1, N*C) store only when the slab is 128-aligned.
        dense_out = (N * C) % 128 == 0

    def build_and_run(fuse, dense):
        kernel = functools.partial(ec_kernel, fuse_conv2=fuse, dense_out=dense)
        if dense:
            out_shape = jax.ShapeDtypeStruct((B, 1, N * C), jnp.float32)
            out_spec = pl.BlockSpec((tb, 1, N * C), lambda g: (g, 0, 0))
        else:
            out_shape = jax.ShapeDtypeStruct((B, N, C), jnp.float32)
            out_spec = pl.BlockSpec((tb, N, C), lambda g: (g, 0, 0))
        w2_arg = w2f if fuse else w2_3
        w2_spec = (pl.BlockSpec((C, 3 * C), lambda g: (0, 0)) if fuse
                   else pl.BlockSpec((3, C, C), lambda g: (0, 0, 0)))
        cfea_spec = pl.BlockSpec((tb, N, F), lambda g: (g, 0, 0))
        if cfea_buffers != 2:   # optional deeper pipelining on the main stream
            cfea_spec = pl.BlockSpec((tb, N, F), lambda g: (g, 0, 0),
                                     pipeline_mode=pl.Buffered(cfea_buffers))
        return pl.pallas_call(
            kernel,
            out_shape=out_shape,
            grid=(B // tb,),
            in_specs=[
                pl.BlockSpec((tb, 1, F), lambda g: (g, 0, 0)),    # e_fea
                cfea_spec,                                        # c_fea
                pl.BlockSpec((2, 1, F), lambda g: (0, 0, 0)),     # [v_e, v_c]
                pl.BlockSpec((5, 1, C), lambda g: (0, 0, 0)),     # conv1 pack
                w2_spec,                                          # conv2 taps
            ],
            out_specs=out_spec,
            compiler_params=pltpu.CompilerParams(
                dimension_semantics=("parallel",),
                vmem_limit_bytes=48 << 20),
        )(e3, yc, sim_w, wpack, w2_arg)

    try:
        raw = build_and_run(fuse_conv2, dense_out)
    except Exception:  # noqa: BLE001 - older Mosaic: no minor-dim slice/reshape
        raw = build_and_run(False, False)

    # (B,1,N*C) and (B,N,C) have identical row-major element order.
    return raw.reshape(B, N, 1, C)


# ----------------------------------------------------------------------------
# Pure-JAX reference (PyTorch semantics, eval mode) — un-folded path
# ----------------------------------------------------------------------------
def reference(e, c, p):
    eps = 1e-8
    H = p["We"].shape[0]
    dots = jnp.einsum("bnf,bf->bn", c, e)                               # (B, N)
    x2 = jnp.sum(e * e, axis=-1)                                        # (B,)
    y2 = jnp.sum(c * c, axis=-1)                                        # (B, N)
    cs = dots / jnp.sqrt(jnp.maximum(x2[:, None] * y2, eps * eps))
    es = dots
    x_lin = e @ p["We"].T + p["be"]                                     # (B, H)
    y_lin = c @ p["Wc"].T + p["bc"]                                     # (B, N, H)
    cos = ((x_lin @ p["Wec"][0, :H])[:, None]
           + y_lin @ p["Wec"][0, H:] + p["bec"][0])
    s = jnp.stack([cs, es, cos], axis=-1)                               # (B, N, 3)
    s_nchw = jnp.transpose(s[:, :, None, :], (0, 3, 1, 2))              # (B, 3, N, 1)
    h = lax.conv_general_dilated(s_nchw, p["W1"], (1, 1), "VALID",
                                 dimension_numbers=("NCHW", "OIHW", "NCHW"))
    h = h + p["b1"][None, :, None, None]
    h = jnp.where(h > 0, h, 0.1 * h)
    o = lax.conv_general_dilated(h, p["W2"], (1, 1), ((1, 1), (1, 1)),
                                 dimension_numbers=("NCHW", "OIHW", "NCHW"))
    o = o + p["b2"][None, :, None, None]
    o = jnp.where(o > 0, o, 0.1 * o)
    return jnp.transpose(o, (0, 2, 3, 1))                               # (B, N, 1, C)


if __name__ == "__main__":
    # Small shapes consistent with the module's forward.
    B, N, F, H, C = 2, 8, 16, 32, 4

    key = jax.random.PRNGKey(0)
    ks = jax.random.split(key, 12)
    params = {
        "We": 0.1 * jax.random.normal(ks[0], (H, F), jnp.float32),
        "be": 0.1 * jax.random.normal(ks[1], (H,), jnp.float32),
        "Wc": 0.1 * jax.random.normal(ks[2], (H, F), jnp.float32),
        "bc": 0.1 * jax.random.normal(ks[3], (H,), jnp.float32),
        "Wec": 0.1 * jax.random.normal(ks[4], (1, 2 * H), jnp.float32),
        "bec": 0.1 * jax.random.normal(ks[5], (1,), jnp.float32),
        "W1": 0.1 * jax.random.normal(ks[6], (C, 3, 1, 1), jnp.float32),
        "b1": 0.1 * jax.random.normal(ks[7], (C,), jnp.float32),
        "W2": 0.1 * jax.random.normal(ks[8], (C, C, 3, 3), jnp.float32),
        "b2": 0.1 * jax.random.normal(ks[9], (C,), jnp.float32),
    }
    e_fea = jax.random.normal(ks[10], (B, F), jnp.float32)
    c_fea = jax.random.normal(ks[11], (B, N, F), jnp.float32)

    out = ec_feature_extract(e_fea, c_fea, params)
    out = jax.block_until_ready(out)
    assert out.shape == (B, N, 1, C), out.shape

    ref = jax.block_until_ready(reference(e_fea, c_fea, params))
    err = jnp.max(jnp.abs(out - ref))
    assert jnp.allclose(out, ref, rtol=2e-3, atol=2e-3), f"max abs err {err}"

    print("KERNEL_OK")
</pallas_src>

<mosaic_0001>
module attributes {stable_mosaic.version = 11 : i64} {
  func.func @ec_kernel(%arg0: i32, %arg1: memref<1x1x16xf32, #tpu.memory_space<vmem>>, %arg2: memref<1x8x16xf32, #tpu.memory_space<vmem>>, %arg3: memref<2x1x16xf32, #tpu.memory_space<vmem>>, %arg4: memref<5x1x4xf32, #tpu.memory_space<vmem>>, %arg5: memref<4x12xf32, #tpu.memory_space<vmem>>, %arg6: memref<1x8x4xf32, #tpu.memory_space<vmem>>) attributes {dimension_semantics = [#tpu.dimension_semantics<parallel>], iteration_bounds = array<i64: 2>, scalar_prefetch = 0 : i64, scratch_operands = 0 : i64, tpu.core_type = #tpu.core_type<tc>, window_params = [{transform_indices = @transform_0, window_bounds = array<i64: 1, 1, 16>}, {transform_indices = @transform_1, window_bounds = array<i64: 1, 8, 16>}, {pipeline_mode = #tpu.pipeline_mode<synchronous>, transform_indices = @transform_2, window_bounds = array<i64: 2, 1, 16>}, {pipeline_mode = #tpu.pipeline_mode<synchronous>, transform_indices = @transform_3, window_bounds = array<i64: 5, 1, 4>}, {pipeline_mode = #tpu.pipeline_mode<synchronous>, transform_indices = @transform_4, window_bounds = array<i64: 4, 12>}, {transform_indices = @transform_5, window_bounds = array<i64: 1, 8, 4>}]} {
    %c0 = arith.constant 0 : index
    %c0_0 = arith.constant 0 : index
    %c0_1 = arith.constant 0 : index
    %0 = vector.load %arg2[%c0, %c0_0, %c0_1] : memref<1x8x16xf32, #tpu.memory_space<vmem>>, vector<1x8x16xf32>
    %c0_2 = arith.constant 0 : index
    %c0_3 = arith.constant 0 : index
    %c0_4 = arith.constant 0 : index
    %1 = vector.load %arg1[%c0_2, %c0_3, %c0_4] : memref<1x1x16xf32, #tpu.memory_space<vmem>>, vector<1x1x16xf32>
    %c0_5 = arith.constant 0 : index
    %c0_6 = arith.constant 0 : index
    %c0_7 = arith.constant 0 : index
    %2 = vector.load %arg3[%c0_5, %c0_6, %c0_7] : memref<2x1x16xf32, #tpu.memory_space<vmem>>, vector<2x1x16xf32>
    %3 = vector.extract_strided_slice %2 {offsets = [0, 0, 0], sizes = [1, 1, 16], strides = [1, 1, 1]} : vector<2x1x16xf32> to vector<1x1x16xf32>
    %4 = vector.extract_strided_slice %2 {offsets = [1, 0, 0], sizes = [1, 1, 16], strides = [1, 1, 1]} : vector<2x1x16xf32> to vector<1x1x16xf32>
    %5 = vector.broadcast %1 : vector<1x1x16xf32> to vector<1x8x16xf32>
    %6 = arith.mulf %0, %5 : vector<1x8x16xf32>
    %cst = arith.constant dense<0.000000e+00> : vector<1x8xf32>
    %7 = vector.multi_reduction <add>, %6, %cst [2] : vector<1x8x16xf32> to vector<1x8xf32>
    %8 = vector.shape_cast %7 : vector<1x8xf32> to vector<1x8x1xf32>
    %9 = arith.mulf %0, %0 : vector<1x8x16xf32>
    %cst_8 = arith.constant dense<0.000000e+00> : vector<1x8xf32>
    %10 = vector.multi_reduction <add>, %9, %cst_8 [2] : vector<1x8x16xf32> to vector<1x8xf32>
    %11 = vector.shape_cast %10 : vector<1x8xf32> to vector<1x8x1xf32>
    %12 = vector.broadcast %4 : vector<1x1x16xf32> to vector<1x8x16xf32>
    %13 = arith.mulf %0, %12 : vector<1x8x16xf32>
    %cst_9 = arith.constant dense<0.000000e+00> : vector<1x8xf32>
    %14 = vector.multi_reduction <add>, %13, %cst_9 [2] : vector<1x8x16xf32> to vector<1x8xf32>
    %15 = vector.shape_cast %14 : vector<1x8xf32> to vector<1x8x1xf32>
    %16 = arith.mulf %1, %1 : vector<1x1x16xf32>
    %cst_10 = arith.constant dense<0.000000e+00> : vector<1x1xf32>
    %17 = vector.multi_reduction <add>, %16, %cst_10 [2] : vector<1x1x16xf32> to vector<1x1xf32>
    %18 = vector.shape_cast %17 : vector<1x1xf32> to vector<1x1x1xf32>
    %19 = arith.mulf %1, %3 : vector<1x1x16xf32>
    %cst_11 = arith.constant dense<0.000000e+00> : vector<1x1xf32>
    %20 = vector.multi_reduction <add>, %19, %cst_11 [2] : vector<1x1x16xf32> to vector<1x1xf32>
    %21 = vector.shape_cast %20 : vector<1x1xf32> to vector<1x1x1xf32>
    %22 = vector.broadcast %21 : vector<1x1x1xf32> to vector<1x8x1xf32>
    %23 = arith.addf %22, %15 : vector<1x8x1xf32>
    %24 = vector.broadcast %18 : vector<1x1x1xf32> to vector<1x8x1xf32>
    %25 = arith.mulf %24, %11 : vector<1x8x1xf32>
    %cst_12 = arith.constant 1.000000e-16 : f32
    %26 = vector.broadcast %cst_12 : f32 to vector<1x8x1xf32>
    %27 = arith.maximumf %25, %26 : vector<1x8x1xf32>
    %28 = math.rsqrt %27 : vector<1x8x1xf32>
    %29 = arith.mulf %8, %28 : vector<1x8x1xf32>
    %c0_13 = arith.constant 0 : index
    %c0_14 = arith.constant 0 : index
    %c0_15 = arith.constant 0 : index
    %30 = vector.load %arg4[%c0_13, %c0_14, %c0_15] : memref<5x1x4xf32, #tpu.memory_space<vmem>>, vector<5x1x4xf32>
    %31 = vector.extract_strided_slice %30 {offsets = [0, 0, 0], sizes = [1, 1, 4], strides = [1, 1, 1]} : vector<5x1x4xf32> to vector<1x1x4xf32>
    %32 = vector.extract_strided_slice %30 {offsets = [1, 0, 0], sizes = [1, 1, 4], strides = [1, 1, 1]} : vector<5x1x4xf32> to vector<1x1x4xf32>
    %33 = vector.extract_strided_slice %30 {offsets = [2, 0, 0], sizes = [1, 1, 4], strides = [1, 1, 1]} : vector<5x1x4xf32> to vector<1x1x4xf32>
    %34 = vector.extract_strided_slice %30 {offsets = [3, 0, 0], sizes = [1, 1, 4], strides = [1, 1, 1]} : vector<5x1x4xf32> to vector<1x1x4xf32>
    %35 = vector.extract_strided_slice %30 {offsets = [4, 0, 0], sizes = [1, 1, 4], strides = [1, 1, 1]} : vector<5x1x4xf32> to vector<1x1x4xf32>
    %36 = vector.shape_cast %35 : vector<1x1x4xf32> to vector<1x4xf32>
    %37 = vector.broadcast %29 : vector<1x8x1xf32> to vector<1x8x4xf32>
    %38 = vector.broadcast %31 : vector<1x1x4xf32> to vector<1x8x4xf32>
    %39 = arith.mulf %37, %38 : vector<1x8x4xf32>
    %40 = vector.broadcast %8 : vector<1x8x1xf32> to vector<1x8x4xf32>
    %41 = vector.broadcast %32 : vector<1x1x4xf32> to vector<1x8x4xf32>
    %42 = arith.mulf %40, %41 : vector<1x8x4xf32>
    %43 = arith.addf %39, %42 : vector<1x8x4xf32>
    %44 = vector.broadcast %23 : vector<1x8x1xf32> to vector<1x8x4xf32>
    %45 = vector.broadcast %33 : vector<1x1x4xf32> to vector<1x8x4xf32>
    %46 = arith.mulf %44, %45 : vector<1x8x4xf32>
    %47 = arith.addf %43, %46 : vector<1x8x4xf32>
    %48 = vector.broadcast %34 : vector<1x1x4xf32> to vector<1x8x4xf32>
    %49 = arith.addf %47, %48 : vector<1x8x4xf32>
    %cst_16 = arith.constant 0.000000e+00 : f32
    %50 = vector.broadcast %cst_16 : f32 to vector<1x8x4xf32>
    %51 = arith.cmpf ogt, %49, %50 : vector<1x8x4xf32>
    %cst_17 = arith.constant 1.000000e-01 : f32
    %52 = vector.broadcast %cst_17 : f32 to vector<1x8x4xf32>
    %53 = arith.mulf %52, %49 : vector<1x8x4xf32>
    %54 = arith.select %51, %49, %53 : vector<1x8x4xi1>, vector<1x8x4xf32>
    %55 = vector.shape_cast %54 : vector<1x8x4xf32> to vector<8x4xf32>
    %56 = tpu.iota {dimensions = array<i32: 1>} : vector<1x8x1xi32>
    %57 = vector.shape_cast %56 : vector<1x8x1xi32> to vector<8x1xi32>
    %c0_18 = arith.constant 0 : index
    %c0_19 = arith.constant 0 : index
    %58 = vector.load %arg5[%c0_18, %c0_19] : memref<4x12xf32, #tpu.memory_space<vmem>>, vector<4x12xf32>
    %cst_20 = arith.constant dense<0.000000e+00> : vector<8x12xf32>
    %59 = tpu.matmul %55, %58, %cst_20 {dimension_numbers = #tpu.dot_dimension_numbers<[1], [0], [0], [1], [0, 0, 1, 1], [], []>} : vector<8x4xf32>, vector<4x12xf32>, vector<8x12xf32> -> vector<8x12xf32>
    %c0_i32 = arith.constant 0 : i32
    %60 = vector.broadcast %c0_i32 : i32 to vector<8x1xi32>
    %61 = arith.cmpi eq, %57, %60 : vector<8x1xi32>
    %62 = vector.extract_strided_slice %59 {offsets = [0, 0], sizes = [8, 4], strides = [1, 1]} : vector<8x12xf32> to vector<8x4xf32>
    %c1_i32 = arith.constant 1 : i32
    %63 = tpu.dynamic_rotate %62 by %c1_i32 dim 0 : vector<8x4xf32>, i32 -> vector<8x4xf32>
    %cst_21 = arith.constant 0.000000e+00 : f32
    %64 = vector.shape_cast %61 : vector<8x1xi1> to vector<8x1xi1>
    %65 = vector.broadcast %64 : vector<8x1xi1> to vector<8x4xi1>
    %66 = vector.broadcast %cst_21 : f32 to vector<8x4xf32>
    %67 = arith.select %65, %66, %63 : vector<8x4xi1>, vector<8x4xf32>
    %68 = vector.extract_strided_slice %59 {offsets = [0, 4], sizes = [8, 4], strides = [1, 1]} : vector<8x12xf32> to vector<8x4xf32>
    %c7_i32 = arith.constant 7 : i32
    %69 = vector.broadcast %c7_i32 : i32 to vector<8x1xi32>
    %70 = arith.cmpi eq, %57, %69 : vector<8x1xi32>
    %71 = vector.extract_strided_slice %59 {offsets = [0, 8], sizes = [8, 4], strides = [1, 1]} : vector<8x12xf32> to vector<8x4xf32>
    %c7_i32_22 = arith.constant 7 : i32
    %72 = tpu.dynamic_rotate %71 by %c7_i32_22 dim 0 : vector<8x4xf32>, i32 -> vector<8x4xf32>
    %cst_23 = arith.constant 0.000000e+00 : f32
    %73 = vector.shape_cast %70 : vector<8x1xi1> to vector<8x1xi1>
    %74 = vector.broadcast %73 : vector<8x1xi1> to vector<8x4xi1>
    %75 = vector.broadcast %cst_23 : f32 to vector<8x4xf32>
    %76 = arith.select %74, %75, %72 : vector<8x4xi1>, vector<8x4xf32>
    %77 = arith.addf %67, %68 : vector<8x4xf32>
    %78 = arith.addf %77, %76 : vector<8x4xf32>
    %79 = vector.broadcast %36 : vector<1x4xf32> to vector<8x4xf32>
    %80 = arith.addf %78, %79 : vector<8x4xf32>
    %cst_24 = arith.constant 0.000000e+00 : f32
    %81 = vector.broadcast %cst_24 : f32 to vector<8x4xf32>
    %82 = arith.cmpf ogt, %80, %81 : vector<8x4xf32>
    %cst_25 = arith.constant 1.000000e-01 : f32
    %83 = vector.broadcast %cst_25 : f32 to vector<8x4xf32>
    %84 = arith.mulf %83, %80 : vector<8x4xf32>
    %85 = arith.select %82, %80, %84 : vector<8x4xi1>, vector<8x4xf32>
    %86 = vector.shape_cast %85 : vector<8x4xf32> to vector<1x8x4xf32>
    %c0_26 = arith.constant 0 : index
    %c0_27 = arith.constant 0 : index
    %c0_28 = arith.constant 0 : index
    %87 = vector.load %arg6[%c0_26, %c0_27, %c0_28] : memref<1x8x4xf32, #tpu.memory_space<vmem>>, vector<1x8x4xf32>
    tpu.vector_store %arg6[%c0_26, %c0_27, %c0_28], %86 {strides = array<i32>} : memref<1x8x4xf32, #tpu.memory_space<vmem>>, vector<1x8x4xf32>,
    return
  }
  func.func @transform_0(%arg0: i32) -> (i32, i32, i32) {
    %c0_i32 = arith.constant 0 : i32
    %c0_i32_0 = arith.constant 0 : i32
    %c0_i32_1 = arith.constant 0 : i32
    return %arg0, %c0_i32, %c0_i32_0 : i32, i32, i32
  }
  func.func @transform_1(%arg0: i32) -> (i32, i32, i32) {
    %c0_i32 = arith.constant 0 : i32
    %c0_i32_0 = arith.constant 0 : i32
    %c0_i32_1 = arith.constant 0 : i32
    return %arg0, %c0_i32, %c0_i32_0 : i32, i32, i32
  }
  func.func @transform_2(%arg0: i32) -> (i32, i32, i32) {
    %c0_i32 = arith.constant 0 : i32
    %c0_i32_0 = arith.constant 0 : i32
    %c0_i32_1 = arith.constant 0 : i32
    %c0_i32_2 = arith.constant 0 : i32
    return %c0_i32, %c0_i32_0, %c0_i32_1 : i32, i32, i32
  }
  func.func @transform_3(%arg0: i32) -> (i32, i32, i32) {
    %c0_i32 = arith.constant 0 : i32
    %c0_i32_0 = arith.constant 0 : i32
    %c0_i32_1 = arith.constant 0 : i32
    %c0_i32_2 = arith.constant 0 : i32
    return %c0_i32, %c0_i32_0, %c0_i32_1 : i32, i32, i32
  }
  func.func @transform_4(%arg0: i32) -> (i32, i32) {
    %c0_i32 = arith.constant 0 : i32
    %c0_i32_0 = arith.constant 0 : i32
    %c0_i32_1 = arith.constant 0 : i32
    return %c0_i32, %c0_i32_0 : i32, i32
  }
  func.func @transform_5(%arg0: i32) -> (i32, i32, i32) {
    %c0_i32 = arith.constant 0 : i32
    %c0_i32_0 = arith.constant 0 : i32
    %c0_i32_1 = arith.constant 0 : i32
    return %arg0, %c0_i32, %c0_i32_0 : i32, i32, i32
  }
}

module attributes {stable_mosaic.version = 11 : i64} {
  func.func @ec_kernel(%arg0: i32, %arg1: memref<1x1x16xf32, #tpu.memory_space<vmem>>, %arg2: memref<1x8x16xf32, #tpu.memory_space<vmem>>, %arg3: memref<2x1x16xf32, #tpu.memory_space<vmem>>, %arg4: memref<5x1x4xf32, #tpu.memory_space<vmem>>, %arg5: memref<3x4x4xf32, #tpu.memory_space<vmem>>, %arg6: memref<1x8x4xf32, #tpu.memory_space<vmem>>) attributes {dimension_semantics = [#tpu.dimension_semantics<parallel>], iteration_bounds = array<i64: 2>, scalar_prefetch = 0 : i64, scratch_operands = 0 : i64, tpu.core_type = #tpu.core_type<tc>, window_params = [{transform_indices = @transform_0, window_bounds = array<i64: 1, 1, 16>}, {transform_indices = @transform_1, window_bounds = array<i64: 1, 8, 16>}, {pipeline_mode = #tpu.pipeline_mode<synchronous>, transform_indices = @transform_2, window_bounds = array<i64: 2, 1, 16>}, {pipeline_mode = #tpu.pipeline_mode<synchronous>, transform_indices = @transform_3, window_bounds = array<i64: 5, 1, 4>}, {pipeline_mode = #tpu.pipeline_mode<synchronous>, transform_indices = @transform_4, window_bounds = array<i64: 3, 4, 4>}, {transform_indices = @transform_5, window_bounds = array<i64: 1, 8, 4>}]} {
    %c0 = arith.constant 0 : index
    %c0_0 = arith.constant 0 : index
    %c0_1 = arith.constant 0 : index
    %0 = vector.load %arg2[%c0, %c0_0, %c0_1] : memref<1x8x16xf32, #tpu.memory_space<vmem>>, vector<1x8x16xf32>
    %c0_2 = arith.constant 0 : index
    %c0_3 = arith.constant 0 : index
    %c0_4 = arith.constant 0 : index
    %1 = vector.load %arg1[%c0_2, %c0_3, %c0_4] : memref<1x1x16xf32, #tpu.memory_space<vmem>>, vector<1x1x16xf32>
    %c0_5 = arith.constant 0 : index
    %c0_6 = arith.constant 0 : index
    %c0_7 = arith.constant 0 : index
    %2 = vector.load %arg3[%c0_5, %c0_6, %c0_7] : memref<2x1x16xf32, #tpu.memory_space<vmem>>, vector<2x1x16xf32>
    %3 = vector.extract_strided_slice %2 {offsets = [0, 0, 0], sizes = [1, 1, 16], strides = [1, 1, 1]} : vector<2x1x16xf32> to vector<1x1x16xf32>
    %4 = vector.extract_strided_slice %2 {offsets = [1, 0, 0], sizes = [1, 1, 16], strides = [1, 1, 1]} : vector<2x1x16xf32> to vector<1x1x16xf32>
    %5 = vector.broadcast %1 : vector<1x1x16xf32> to vector<1x8x16xf32>
    %6 = arith.mulf %0, %5 : vector<1x8x16xf32>
    %cst = arith.constant dense<0.000000e+00> : vector<1x8xf32>
    %7 = vector.multi_reduction <add>, %6, %cst [2] : vector<1x8x16xf32> to vector<1x8xf32>
    %8 = vector.shape_cast %7 : vector<1x8xf32> to vector<1x8x1xf32>
    %9 = arith.mulf %0, %0 : vector<1x8x16xf32>
    %cst_8 = arith.constant dense<0.000000e+00> : vector<1x8xf32>
    %10 = vector.multi_reduction <add>, %9, %cst_8 [2] : vector<1x8x16xf32> to vector<1x8xf32>
    %11 = vector.shape_cast %10 : vector<1x8xf32> to vector<1x8x1xf32>
    %12 = vector.broadcast %4 : vector<1x1x16xf32> to vector<1x8x16xf32>
    %13 = arith.mulf %0, %12 : vector<1x8x16xf32>
    %cst_9 = arith.constant dense<0.000000e+00> : vector<1x8xf32>
    %14 = vector.multi_reduction <add>, %13, %cst_9 [2] : vector<1x8x16xf32> to vector<1x8xf32>
    %15 = vector.shape_cast %14 : vector<1x8xf32> to vector<1x8x1xf32>
    %16 = arith.mulf %1, %1 : vector<1x1x16xf32>
    %cst_10 = arith.constant dense<0.000000e+00> : vector<1x1xf32>
    %17 = vector.multi_reduction <add>, %16, %cst_10 [2] : vector<1x1x16xf32> to vector<1x1xf32>
    %18 = vector.shape_cast %17 : vector<1x1xf32> to vector<1x1x1xf32>
    %19 = arith.mulf %1, %3 : vector<1x1x16xf32>
    %cst_11 = arith.constant dense<0.000000e+00> : vector<1x1xf32>
    %20 = vector.multi_reduction <add>, %19, %cst_11 [2] : vector<1x1x16xf32> to vector<1x1xf32>
    %21 = vector.shape_cast %20 : vector<1x1xf32> to vector<1x1x1xf32>
    %22 = vector.broadcast %21 : vector<1x1x1xf32> to vector<1x8x1xf32>
    %23 = arith.addf %22, %15 : vector<1x8x1xf32>
    %24 = vector.broadcast %18 : vector<1x1x1xf32> to vector<1x8x1xf32>
    %25 = arith.mulf %24, %11 : vector<1x8x1xf32>
    %cst_12 = arith.constant 1.000000e-16 : f32
    %26 = vector.broadcast %cst_12 : f32 to vector<1x8x1xf32>
    %27 = arith.maximumf %25, %26 : vector<1x8x1xf32>
    %28 = math.rsqrt %27 : vector<1x8x1xf32>
    %29 = arith.mulf %8, %28 : vector<1x8x1xf32>
    %c0_13 = arith.constant 0 : index
    %c0_14 = arith.constant 0 : index
    %c0_15 = arith.constant 0 : index
    %30 = vector.load %arg4[%c0_13, %c0_14, %c0_15] : memref<5x1x4xf32, #tpu.memory_space<vmem>>, vector<5x1x4xf32>
    %31 = vector.extract_strided_slice %30 {offsets = [0, 0, 0], sizes = [1, 1, 4], strides = [1, 1, 1]} : vector<5x1x4xf32> to vector<1x1x4xf32>
    %32 = vector.extract_strided_slice %30 {offsets = [1, 0, 0], sizes = [1, 1, 4], strides = [1, 1, 1]} : vector<5x1x4xf32> to vector<1x1x4xf32>
    %33 = vector.extract_strided_slice %30 {offsets = [2, 0, 0], sizes = [1, 1, 4], strides = [1, 1, 1]} : vector<5x1x4xf32> to vector<1x1x4xf32>
    %34 = vector.extract_strided_slice %30 {offsets = [3, 0, 0], sizes = [1, 1, 4], strides = [1, 1, 1]} : vector<5x1x4xf32> to vector<1x1x4xf32>
    %35 = vector.extract_strided_slice %30 {offsets = [4, 0, 0], sizes = [1, 1, 4], strides = [1, 1, 1]} : vector<5x1x4xf32> to vector<1x1x4xf32>
    %36 = vector.shape_cast %35 : vector<1x1x4xf32> to vector<1x4xf32>
    %37 = vector.broadcast %29 : vector<1x8x1xf32> to vector<1x8x4xf32>
    %38 = vector.broadcast %31 : vector<1x1x4xf32> to vector<1x8x4xf32>
    %39 = arith.mulf %37, %38 : vector<1x8x4xf32>
    %40 = vector.broadcast %8 : vector<1x8x1xf32> to vector<1x8x4xf32>
    %41 = vector.broadcast %32 : vector<1x1x4xf32> to vector<1x8x4xf32>
    %42 = arith.mulf %40, %41 : vector<1x8x4xf32>
    %43 = arith.addf %39, %42 : vector<1x8x4xf32>
    %44 = vector.broadcast %23 : vector<1x8x1xf32> to vector<1x8x4xf32>
    %45 = vector.broadcast %33 : vector<1x1x4xf32> to vector<1x8x4xf32>
    %46 = arith.mulf %44, %45 : vector<1x8x4xf32>
    %47 = arith.addf %43, %46 : vector<1x8x4xf32>
    %48 = vector.broadcast %34 : vector<1x1x4xf32> to vector<1x8x4xf32>
    %49 = arith.addf %47, %48 : vector<1x8x4xf32>
    %cst_16 = arith.constant 0.000000e+00 : f32
    %50 = vector.broadcast %cst_16 : f32 to vector<1x8x4xf32>
    %51 = arith.cmpf ogt, %49, %50 : vector<1x8x4xf32>
    %cst_17 = arith.constant 1.000000e-01 : f32
    %52 = vector.broadcast %cst_17 : f32 to vector<1x8x4xf32>
    %53 = arith.mulf %52, %49 : vector<1x8x4xf32>
    %54 = arith.select %51, %49, %53 : vector<1x8x4xi1>, vector<1x8x4xf32>
    %55 = vector.shape_cast %54 : vector<1x8x4xf32> to vector<8x4xf32>
    %56 = tpu.iota {dimensions = array<i32: 1>} : vector<1x8x1xi32>
    %57 = vector.shape_cast %56 : vector<1x8x1xi32> to vector<8x1xi32>
    %c0_i32 = arith.constant 0 : i32
    %58 = vector.broadcast %c0_i32 : i32 to vector<8x1xi32>
    %59 = arith.cmpi eq, %57, %58 : vector<8x1xi32>
    %c1_i32 = arith.constant 1 : i32
    %60 = tpu.dynamic_rotate %55 by %c1_i32 dim 0 : vector<8x4xf32>, i32 -> vector<8x4xf32>
    %cst_18 = arith.constant 0.000000e+00 : f32
    %61 = vector.shape_cast %59 : vector<8x1xi1> to vector<8x1xi1>
    %62 = vector.broadcast %61 : vector<8x1xi1> to vector<8x4xi1>
    %63 = vector.broadcast %cst_18 : f32 to vector<8x4xf32>
    %64 = arith.select %62, %63, %60 : vector<8x4xi1>, vector<8x4xf32>
    %c7_i32 = arith.constant 7 : i32
    %65 = vector.broadcast %c7_i32 : i32 to vector<8x1xi32>
    %66 = arith.cmpi eq, %57, %65 : vector<8x1xi32>
    %c7_i32_19 = arith.constant 7 : i32
    %67 = tpu.dynamic_rotate %55 by %c7_i32_19 dim 0 : vector<8x4xf32>, i32 -> vector<8x4xf32>
    %cst_20 = arith.constant 0.000000e+00 : f32
    %68 = vector.shape_cast %66 : vector<8x1xi1> to vector<8x1xi1>
    %69 = vector.broadcast %68 : vector<8x1xi1> to vector<8x4xi1>
    %70 = vector.broadcast %cst_20 : f32 to vector<8x4xf32>
    %71 = arith.select %69, %70, %67 : vector<8x4xi1>, vector<8x4xf32>
    %c0_21 = arith.constant 0 : index
    %c0_22 = arith.constant 0 : index
    %c0_23 = arith.constant 0 : index
    %72 = vector.load %arg5[%c0_21, %c0_22, %c0_23] : memref<3x4x4xf32, #tpu.memory_space<vmem>>, vector<1x4x4xf32>
    %73 = vector.shape_cast %72 : vector<1x4x4xf32> to vector<4x4xf32>
    %cst_24 = arith.constant dense<0.000000e+00> : vector<8x4xf32>
    %74 = tpu.matmul %64, %73, %cst_24 {dimension_numbers = #tpu.dot_dimension_numbers<[1], [0], [0], [1], [0, 0, 1, 1], [], []>} : vector<8x4xf32>, vector<4x4xf32>, vector<8x4xf32> -> vector<8x4xf32>
    %c1 = arith.constant 1 : index
    %c0_25 = arith.constant 0 : index
    %c0_26 = arith.constant 0 : index
    %75 = vector.load %arg5[%c1, %c0_25, %c0_26] : memref<3x4x4xf32, #tpu.memory_space<vmem>>, vector<1x4x4xf32>
    %76 = vector.shape_cast %75 : vector<1x4x4xf32> to vector<4x4xf32>
    %cst_27 = arith.constant dense<0.000000e+00> : vector<8x4xf32>
    %77 = tpu.matmul %55, %76, %cst_27 {dimension_numbers = #tpu.dot_dimension_numbers<[1], [0], [0], [1], [0, 0, 1, 1], [], []>} : vector<8x4xf32>, vector<4x4xf32>, vector<8x4xf32> -> vector<8x4xf32>
    %78 = arith.addf %74, %77 : vector<8x4xf32>
    %c2 = arith.constant 2 : index
    %c0_28 = arith.constant 0 : index
    %c0_29 = arith.constant 0 : index
    %79 = vector.load %arg5[%c2, %c0_28, %c0_29] : memref<3x4x4xf32, #tpu.memory_space<vmem>>, vector<1x4x4xf32>
    %80 = vector.shape_cast %79 : vector<1x4x4xf32> to vector<4x4xf32>
    %cst_30 = arith.constant dense<0.000000e+00> : vector<8x4xf32>
    %81 = tpu.matmul %71, %80, %cst_30 {dimension_numbers = #tpu.dot_dimension_numbers<[1], [0], [0], [1], [0, 0, 1, 1], [], []>} : vector<8x4xf32>, vector<4x4xf32>, vector<8x4xf32> -> vector<8x4xf32>
    %82 = arith.addf %78, %81 : vector<8x4xf32>
    %83 = vector.broadcast %36 : vector<1x4xf32> to vector<8x4xf32>
    %84 = arith.addf %82, %83 : vector<8x4xf32>
    %cst_31 = arith.constant 0.000000e+00 : f32
    %85 = vector.broadcast %cst_31 : f32 to vector<8x4xf32>
    %86 = arith.cmpf ogt, %84, %85 : vector<8x4xf32>
    %cst_32 = arith.constant 1.000000e-01 : f32
    %87 = vector.broadcast %cst_32 : f32 to vector<8x4xf32>
    %88 = arith.mulf %87, %84 : vector<8x4xf32>
    %89 = arith.select %86, %84, %88 : vector<8x4xi1>, vector<8x4xf32>
    %90 = vector.shape_cast %89 : vector<8x4xf32> to vector<1x8x4xf32>
    %c0_33 = arith.constant 0 : index
    %c0_34 = arith.constant 0 : index
    %c0_35 = arith.constant 0 : index
    %91 = vector.load %arg6[%c0_33, %c0_34, %c0_35] : memref<1x8x4xf32, #tpu.memory_space<vmem>>, vector<1x8x4xf32>
    tpu.vector_store %arg6[%c0_33, %c0_34, %c0_35], %90 {strides = array<i32>} : memref<1x8x4xf32, #tpu.memory_space<vmem>>, vector<1x8x4xf32>,
    return
  }
  func.func @transform_0(%arg0: i32) -> (i32, i32, i32) {
    %c0_i32 = arith.constant 0 : i32
    %c0_i32_0 = arith.constant 0 : i32
    %c0_i32_1 = arith.constant 0 : i32
    return %arg0, %c0_i32, %c0_i32_0 : i32, i32, i32
  }
  func.func @transform_1(%arg0: i32) -> (i32, i32, i32) {
    %c0_i32 = arith.constant 0 : i32
    %c0_i32_0 = arith.constant 0 : i32
    %c0_i32_1 = arith.constant 0 : i32
    return %arg0, %c0_i32, %c0_i32_0 : i32, i32, i32
  }
  func.func @transform_2(%arg0: i32) -> (i32, i32, i32) {
    %c0_i32 = arith.constant 0 : i32
    %c0_i32_0 = arith.constant 0 : i32
    %c0_i32_1 = arith.constant 0 : i32
    %c0_i32_2 = arith.constant 0 : i32
    return %c0_i32, %c0_i32_0, %c0_i32_1 : i32, i32, i32
  }
  func.func @transform_3(%arg0: i32) -> (i32, i32, i32) {
    %c0_i32 = arith.constant 0 : i32
    %c0_i32_0 = arith.constant 0 : i32
    %c0_i32_1 = arith.constant 0 : i32
    %c0_i32_2 = arith.constant 0 : i32
    return %c0_i32, %c0_i32_0, %c0_i32_1 : i32, i32, i32
  }
  func.func @transform_4(%arg0: i32) -> (i32, i32, i32) {
    %c0_i32 = arith.constant 0 : i32
    %c0_i32_0 = arith.constant 0 : i32
    %c0_i32_1 = arith.constant 0 : i32
    %c0_i32_2 = arith.constant 0 : i32
    return %c0_i32, %c0_i32_0, %c0_i32_1 : i32, i32, i32
  }
  func.func @transform_5(%arg0: i32) -> (i32, i32, i32) {
    %c0_i32 = arith.constant 0 : i32
    %c0_i32_0 = arith.constant 0 : i32
    %c0_i32_1 = arith.constant 0 : i32
    return %arg0, %c0_i32, %c0_i32_0 : i32, i32, i32
  }
}

</mosaic_0001>

<bundles_post_ra>
// kernel: tpu_custom_call.1
= control target key start
LH: loop header
LB: loop body
LE: loop exit
PB: predicated region body
PF: predicated region fallthrough
CT: control target
= control target key end

     0   :  { %10 = vsyncpa [#allocation3], 0  ;;  %s846_s0 = inlined_call_operand.vmem [shape: f32[2,1,16], index: 0, kind: input, shape index: {}]   ;;  %s847_s1 = inlined_call_operand.hbm [shape: f32[2,8,16], index: 1, kind: input, shape index: {}]   ;;  %s848_s2 = inlined_call_operand.vmem [shape: f32[2,1,16], index: 2, kind: input, shape index: {}]   ;;  %s849_s3 = inlined_call_operand.vmem [shape: f32[5,1,4], index: 3, kind: input, shape index: {}]   ;;  %s850_s4 = inlined_call_operand.vmem [shape: f32[4,12], index: 4, kind: input, shape index: {}]   ;;  %s851_s5 = inlined_call_operand.vmem [shape: f32[2,8,4], index: 5, kind: output, shape index: {}]  }
   0x1   :  { %12 = vsyncpa [#allocation3 + $0x1], 0  ;;  %s699_s18 = smov 0   ;;  %s701_s19 = smov 0  }
   0x2   :  { %s703_s20 = smov 0   ;;  %s705_s21 = smov 0  }
   0x3 LB: > { %s718_s22 = sadd.s32 4294967295, %s662_s21   ;;  %s721_s23 = sadd.s32 1, %s662_s21   ;;  %s662_s21 = sphi %s705_s21, %s859_s21   ;;  %s658_s20 = sphi %s703_s20, %s858_s20   ;;  %s654_s19 = sphi %s701_s19, %s857_s19   ;;  %s650_s18 = sphi %s699_s18, %s856_s18  }
   0x4   : > { %s48_s24 = ssub.s32 %s662_s21, %s721_s23  ;;  %s51_s25 = sadd.s32 1, %s658_s20 }
   0x5   : > { %p49_p0 = scmp.eq.s32.totalorder %s48_s24, 0  ;;  %p58_p1 = scmp.ne.s32.totalorder %s658_s20, %s654_s19 }
   0x6   : > { %p59_p2 = scmp.eq.s32.totalorder %s662_s21, 0  ;;  %p64_p3 = scmp.ne.s32.totalorder %s654_s19, %s650_s18 }
   0x7   : > { %s731_s26 = scalar_select %p49_p0, %s658_s20, %s51_s25  }
   0x8   : > { %p60_p4 = por %p59_p2, %p58_p1  ;;  %p65_p5 = scmp.eq.s32.totalorder %s718_s22, 0 }
   0x9   : > { %p559_p6 = scmp.lt.s32.totalorder %s662_s21, 2  ;;  %s192_s28 = sand.u32 1, %s658_s20  }
   0xa   : > { %p735_p7 = por %p65_p5, %p64_p3  ;;  %s531_s29 = sshll.u32 %s192_s28, 3 }
   0xb   : > { %s532_s30 = sshll.u32 %s662_s21, 7  ;;  %s196_s9 = scalar_lea.vmem [#allocation2], %s531_s29 }
   0xc   : > { %s744_s8 = scalar_lea.hbm %s847_s1, %s532_s30  ;;  %s203_s10 = sshll.u32 %s196_s9, 4  ;;  %s746_s10 = int_to_ptr.vmem [resolvable:$true] %s203_s10 }
   0xd   : > { %p748_p8 = pnand %p559_p6, %p60_p4  ;;  %s193_s12 = scalar_lea.sflag [#allocation3], %s192_s28 }
   0xe   : > { %s598_s13 = scalar_lea.hbm %s744_s8, 128  ;;  %s603_s16 = scalar_lea.hbm %s847_s1, 256 }
   0xf   : > { %p599_p11 = scmp.ne.s32.totalorder %s744_s8, %s598_s13  ;;  %p600_p12 = pneg %p748_p8 }
  0x10   : > { %p604_p1 = scmp.lt.u32.totalorder %s744_s8, %s847_s1  ;;  %p605_p2 = scmp.lt.u32.totalorder %s603_s16, %s598_s13 }
  0x11   : > { %p601_p13 = pnand %p600_p12, %p599_p11  ;;  %p607_p4 = scmp.lt.u32.totalorder %s598_s13, %s744_s8 }
  0x12   : > { %p606_p3 = por %p605_p2, %p604_p1 }
  0x13   : > { %p602_p0 = pneg %p601_p13 }
  0x14   : > { %p608_p5 = por %p607_p4, %p606_p3 }
  0x16   : > { %p609_p6 = pnand %p608_p5, %p602_p0 }
  0x18   : > { %612 = shalt.err (!%p609_p6)
}
  0x19   : > { %s613_s24 = scalar_lea.vmem %s746_s10, 128  ;;  %s664_s25 = smov [#allocation2]  }
  0x1a   : > { %p614_p11 = scmp.ne.s32.totalorder %s746_s10, %s613_s24  ;;  %s618_s28 = sshll.u32 %s664_s25, 4  ;;  %s619_s28 = int_to_ptr.vmem [resolvable:$false] %s618_s28 }
  0x1b   : > { %s620_s29 = scalar_lea.vmem %s619_s28, 256  ;;  %p621_p10 = scmp.lt.s32.totalorder %s746_s10, %s619_s28 }
  0x1c   : > { %p616_p13 = pnand %p614_p11, %p600_p12  ;;  %p622_p1 = scmp.lt.s32.totalorder %s620_s29, %s613_s24 }
  0x1e   : > { %p617_p9 = pneg %p616_p13  ;;  %p623_p2 = por %p622_p1, %p621_p10 }
  0x20   : > { %p624_p3 = pnand %p623_p2, %p617_p9 }
  0x22   : > { %627 = shalt.err (!%p624_p3)
}
  0x23   : > { %558 = dma.hbm_to_vmem [thread:$0]  (!%p748_p8), %s744_s8, 128, %s746_s10, %s193_s12  }
  0x24   : > { %p854_p0 = scmp.lt.s32.totalorder %s662_s21, 3  ;;  %p855_p4 = scmp.ge.s32.totalorder %s662_s21, 1 }
  0x26   : > { %p209_p12 = pnand %p855_p4, %p854_p0 }
  0x27   : > { %s214_s30 = sand.u32 (!%p209_p12), 1, %s654_s19  }
  0x28   : > { %212 = sbr.rel (%p209_p12) target bundleno = 568 (0x238), region = 40  ;;  %s534_s6 = sshll.u32 (!%p209_p12), %s214_s30, 3 }
  0x29   : > { %s215_s7 = scalar_lea.sflag (!%p209_p12), [#allocation3], %s214_s30  ;;  %s218_s9 = scalar_lea.vmem (!%p209_p12), [#allocation2], %s534_s6 }
  0x2f   : > { %645 = dma.done.wait (%p735_p7), %s215_s7, 128  }
  0x30   : > { %647 = vsyncadd (%p735_p7), %s215_s7, 4294967168  ;;  %p247_p9 = scmp.lt.s32.totalorder %s718_s22, 1  ;;  %v259_v0 = vlaneseq  ;;  %vm284_vm0 = vcmask 122880   ;;  %v254_v4 = vld [vmem:[%s218_s9] sm:$0xff]  ;;  %vm265_vm1 = vcmask 130048   ;;  %vm350_vm2 = vcmask 1043456  }
  0x31   : > { %v256_v5 = vld [vmem:[%s848_s2] sm:$0x1]  ;;  %v269_v7 = vmul.f32 %v254_v4, %v254_v4  ;;  %v536_v9 = vld [vmem:[%s848_s2 + $0x1] ss:$0 sm:$0xff]  ;;  %v665_v19 = vmov 0.0   ;;  %vm666_vm3 = vmmov 0  }
  0x32   : > { %s861_s22 = smov (!%p247_p9, %s718_s22), 1  ;;  %v792_v1 = vshrl.u32 %v259_v0, 7  ;;  %v279_v15 = vmul.f32 %v536_v9, %v254_v4  ;;  %v345_v18 = vld [vmem:[%s850_s4] sm:$0xf]  ;;  %548 = vmatprep.subr.mxu0 %v665_v19  ;;  %550 = vmatprep.mubr.msk.f32.mxu0 %vm666_vm3, %v665_v19  ;;  %vm346_vm5 = vcmask 31744   ;;  %s667_s6 = smov 124  }
  0x33   : > { %s249_s10 = scalar_lea.vmem %s846_s0, %s861_s22  ;;  %v270_v13 = vsel %vm265_vm1, %v269_v7, 0.0  ;;  %549 = vmatpush3.msk.msra.mxu0 %vm350_vm2, %v345_v18  ;;  %v537_v31 = vld [vmem:[%s849_s3] ss:$0 sm:$0xff]  ;;  %v538_v32 = vld [vmem:[%s849_s3 + $0x1] ss:$0 sm:$0xff]  ;;  %s668_s7 = smov 120  }
  0x34   : > { %v261_v2 = vsub.s32 0, %v792_v1  ;;  %v255_v3 = vld [vmem:[%s249_s10] sm:$0x1]  ;;  %v280_v17 = vsel %vm265_vm1, %v279_v15, 0.0  ;;  %v539_v33 = vld [vmem:[%s849_s3 + $0x2] ss:$0 sm:$0xff] }
  0x35   : > { %v283_v6 = vmul.f32 %v255_v3, %v255_v3  ;;  %v288_v12 = vmul.f32 %v256_v5, %v255_v3  ;;  %v540_v39 = vld [vmem:[%s849_s3 + $0x3] ss:$0 sm:$0xff]  ;;  %vm424_vm6 = vcmp.eq.s32.totalorder %v792_v1, 0  ;;  %vm429_vm7 = vcmp.eq.s32.totalorder %v792_v1, 7  ;;  %v543_v52 = vld [vmem:[%s849_s3 + $0x4] ss:$0 sm:$0xff] }
  0x36   : > { %v262_v8 = vrot.slane %v255_v3, %v261_v2  ;;  %s535_s8 = sshll.u32 %s861_s22, 3 }
  0x37   : > { %v285_v10 = vsel %vm284_vm0, %v283_v6, 0.0  ;;  %v289_v16 = vsel %vm284_vm0, %v288_v12, 0.0  ;;  %s253_s11 = scalar_lea.vmem %s851_s5, %s535_s8 }
  0x38   : > { %v264_v11 = vmul.f32 %v262_v8, %v254_v4  ;;  %286 = vadd.xlane.f32.xlu0 %v285_v10 }
  0x3a   : > { %v266_v14 = vsel %vm265_vm1, %v264_v11, 0.0 }
  0x3b   : > { %267 = vadd.xlane.f32.xlu1 %v266_v14 }
  0x3c   : > { %271 = vadd.xlane.f32.xlu0 %v270_v13 }
  0x3f   : > { %290 = vadd.xlane.f32.xlu1 %v289_v16 }
  0x40   : > { %281 = vadd.xlane.f32.xlu0 %v280_v17 }
  0xc5   : > { %v287_v20 = vpop.xlane.xlu0 %286 }
  0xc6   : > { %v300_v21 = vrot.slane %v287_v20, %v261_v2 }
  0xc8   : > { %v268_v24 = vpop.xlane.xlu1 %267 }
  0xc9   : > { %v272_v22 = vpop.xlane.xlu0 %271  ;;  %v323_v36 = vmul.f32 %v538_v32, %v268_v24 }
  0xca   : > { %v301_v23 = vmul.f32 %v300_v21, %v272_v22 }
  0xcc   : > { %v302_v25 = vmax.f32 %v301_v23, 1e-16  ;;  %v291_v26 = vpop.xlane.xlu1 %290 }
  0xcd   : > { %v295_v27 = vrot.slane %v291_v26, %v261_v2  ;;  %v282_v28 = vpop.xlane.xlu0 %281 }
  0xce   : > { %596 = vrsqrt.f32 %v302_v25 }
  0xcf   : > { %v296_v29 = vadd.f32 %v295_v27, %v282_v28 }
  0xd1   : > { %v331_v37 = vmul.f32 %v539_v33, %v296_v29 }
  0xd8   : > { %v597_v30 = vpop.eup %596 }
  0xd9   : > { %v304_v34 = vmul.f32 %v597_v30, %v268_v24 }
  0xdb   : > { %v316_v35 = vmul.f32 %v537_v31, %v304_v34 }
  0xdd   : > { %v324_v38 = vadd.f32 %v323_v36, %v316_v35 }
  0xdf   : > { %v332_v40 = vadd.f32 %v331_v37, %v324_v38 }
  0xe1   : > { %v339_v41 = vadd.f32 %v540_v39, %v332_v40 }
  0xe3   : > { %vm340_vm4 = vcmp.gt.f32.partialorder %v339_v41, 0.0  ;;  %v341_v42 = vmul.f32 0.1, %v339_v41 }
  0xe5   : > { %v342_v43 = vsel %vm340_vm4, %v339_v41, %v341_v42 }
  0xe6   : > { %551 = vmatmul.mubr.msk.f32.vlgmr.msra.gmra.mrb[0].mxu0 %vm346_vm5, %v342_v43 }
 0x1b9   : > { %v420_v44 = vpop.f32.mrb[0].mxu0 }
 0x1ba   : > { %438 = vrot.lane.b32.xlu0 %v420_v44, %s667_s6  ;;  %431 = vrot.lane.b32.xlu1 %v420_v44, %s668_s7  ;;  %v552_v45 = vpop.f32.mrb[1].mxu0  ;;  %v425_v46 = vrot.slane %v420_v44, 7 }
 0x1bc   : > { %v428_v48 = vsel %vm424_vm6, 0.0, %v425_v46 }
 0x22c   : > { %v439_v47 = vpop.permute.xlu0 %438  ;;  %v432_v49 = vpop.permute.xlu1 %431 }
 0x22d   : > { %v441_v50 = vadd.f32 %v439_v47, %v428_v48  ;;  %v434_v51 = vrot.slane %v432_v49, 1 }
 0x22f   : > { %v437_v53 = vsel %vm429_vm7, 0.0, %v434_v51 }
 0x230   : > { %v442_v54 = vadd.f32 %v441_v50, %v437_v53 }
 0x232   : > { %v449_v55 = vadd.f32 %v543_v52, %v442_v54 }
 0x234   : > { %vm450_vm8 = vcmp.gt.f32.partialorder %v449_v55, 0.0  ;;  %v451_v56 = vmul.f32 0.1, %v449_v55 }
 0x236   : > { %v452_v57 = vsel %vm450_vm8, %v449_v55, %v451_v56 }
 0x237   : > { %453 = vst.msk [vmem:[%s253_s11] sm:$0xff] %vm346_vm5, %v452_v57 }
 0x238 PF: > { %p15_p7 = scmp.ge.s32.totalorder %s721_s23, 4   ;;  %s856_s18 = smov %s654_s19 }
 0x239   : > { %s857_s19 = smov %s658_s20  ;;  %s858_s20 = smov %s731_s26 }
 0x23a   : > { %s859_s21 = smov %s721_s23  ;;  %17 = sbr.rel (!%p15_p7) target bundleno = 3 (0x3), region = 83 }
 0x241   :  { %473 = vsyncpa [#allocation3], 1 }
 0x242   :  { %475 = vsyncpa [#allocation3 + $0x1], 1 }

// kernel: tpu_custom_call.1
= control target key start
LH: loop header
LB: loop body
LE: loop exit
PB: predicated region body
PF: predicated region fallthrough
CT: control target
= control target key end

     0   :  { %10 = vsyncpa [#allocation3], 0  ;;  %s1024_s0 = inlined_call_operand.vmem [shape: f32[2,1,16], index: 0, kind: input, shape index: {}]   ;;  %s1025_s1 = inlined_call_operand.hbm [shape: f32[2,8,16], index: 1, kind: input, shape index: {}]   ;;  %s1026_s2 = inlined_call_operand.vmem [shape: f32[2,1,16], index: 2, kind: input, shape index: {}]   ;;  %s1027_s3 = inlined_call_operand.vmem [shape: f32[5,1,4], index: 3, kind: input, shape index: {}]   ;;  %s1028_s4 = inlined_call_operand.vmem [shape: f32[3,4,4], index: 4, kind: input, shape index: {}]   ;;  %s1029_s5 = inlined_call_operand.vmem [shape: f32[2,8,4], index: 5, kind: output, shape index: {}]  }
   0x1   :  { %12 = vsyncpa [#allocation3 + $0x1], 0  ;;  %s863_s18 = smov 0   ;;  %s865_s19 = smov 0  }
   0x2   :  { %s867_s20 = smov 0   ;;  %s869_s21 = smov 0  }
   0x3 LB: > { %s882_s22 = sadd.s32 4294967295, %s828_s21   ;;  %s885_s23 = sadd.s32 1, %s828_s21   ;;  %s828_s21 = sphi %s869_s21, %s1037_s21   ;;  %s824_s20 = sphi %s867_s20, %s1036_s20   ;;  %s820_s19 = sphi %s865_s19, %s1035_s19   ;;  %s816_s18 = sphi %s863_s18, %s1034_s18  }
   0x4   : > { %s48_s24 = ssub.s32 %s828_s21, %s885_s23  ;;  %s51_s25 = sadd.s32 1, %s824_s20 }
   0x5   : > { %p49_p0 = scmp.eq.s32.totalorder %s48_s24, 0  ;;  %p58_p1 = scmp.ne.s32.totalorder %s824_s20, %s820_s19 }
   0x6   : > { %p59_p2 = scmp.eq.s32.totalorder %s828_s21, 0  ;;  %p64_p3 = scmp.ne.s32.totalorder %s820_s19, %s816_s18 }
   0x7   : > { %s895_s26 = scalar_select %p49_p0, %s824_s20, %s51_s25  }
   0x8   : > { %p60_p4 = por %p59_p2, %p58_p1  ;;  %p65_p5 = scmp.eq.s32.totalorder %s882_s22, 0 }
   0x9   : > { %p727_p6 = scmp.lt.s32.totalorder %s828_s21, 2  ;;  %s192_s28 = sand.u32 1, %s824_s20  }
   0xa   : > { %p899_p7 = por %p65_p5, %p64_p3  ;;  %s679_s29 = sshll.u32 %s192_s28, 3 }
   0xb   : > { %s680_s30 = sshll.u32 %s828_s21, 7  ;;  %s196_s9 = scalar_lea.vmem [#allocation2], %s679_s29 }
   0xc   : > { %s908_s8 = scalar_lea.hbm %s1025_s1, %s680_s30  ;;  %s203_s10 = sshll.u32 %s196_s9, 4  ;;  %s910_s10 = int_to_ptr.vmem [resolvable:$true] %s203_s10 }
   0xd   : > { %p912_p8 = pnand %p727_p6, %p60_p4  ;;  %s193_s12 = scalar_lea.sflag [#allocation3], %s192_s28 }
   0xe   : > { %s764_s13 = scalar_lea.hbm %s908_s8, 128  ;;  %s769_s16 = scalar_lea.hbm %s1025_s1, 256 }
   0xf   : > { %p765_p11 = scmp.ne.s32.totalorder %s908_s8, %s764_s13  ;;  %p766_p12 = pneg %p912_p8 }
  0x10   : > { %p770_p1 = scmp.lt.u32.totalorder %s908_s8, %s1025_s1  ;;  %p771_p2 = scmp.lt.u32.totalorder %s769_s16, %s764_s13 }
  0x11   : > { %p767_p13 = pnand %p766_p12, %p765_p11  ;;  %p773_p4 = scmp.lt.u32.totalorder %s764_s13, %s908_s8 }
  0x12   : > { %p772_p3 = por %p771_p2, %p770_p1 }
  0x13   : > { %p768_p0 = pneg %p767_p13 }
  0x14   : > { %p774_p5 = por %p773_p4, %p772_p3 }
  0x16   : > { %p775_p6 = pnand %p774_p5, %p768_p0 }
  0x18   : > { %778 = shalt.err (!%p775_p6)
}
  0x19   : > { %s779_s24 = scalar_lea.vmem %s910_s10, 128  ;;  %s830_s25 = smov [#allocation2]  }
  0x1a   : > { %p780_p11 = scmp.ne.s32.totalorder %s910_s10, %s779_s24  ;;  %s784_s28 = sshll.u32 %s830_s25, 4  ;;  %s785_s28 = int_to_ptr.vmem [resolvable:$false] %s784_s28 }
  0x1b   : > { %s786_s29 = scalar_lea.vmem %s785_s28, 256  ;;  %p787_p10 = scmp.lt.s32.totalorder %s910_s10, %s785_s28 }
  0x1c   : > { %p782_p13 = pnand %p780_p11, %p766_p12  ;;  %p788_p1 = scmp.lt.s32.totalorder %s786_s29, %s779_s24 }
  0x1e   : > { %p783_p9 = pneg %p782_p13  ;;  %p789_p2 = por %p788_p1, %p787_p10 }
  0x20   : > { %p790_p3 = pnand %p789_p2, %p783_p9 }
  0x22   : > { %793 = shalt.err (!%p790_p3)
}
  0x23   : > { %726 = dma.hbm_to_vmem [thread:$0]  (!%p912_p8), %s908_s8, 128, %s910_s10, %s193_s12  }
  0x24   : > { %p1032_p0 = scmp.lt.s32.totalorder %s828_s21, 3  ;;  %p1033_p4 = scmp.ge.s32.totalorder %s828_s21, 1 }
  0x26   : > { %p209_p12 = pnand %p1033_p4, %p1032_p0 }
  0x27   : > { %s214_s30 = sand.u32 (!%p209_p12), 1, %s820_s19  }
  0x28   : > { %212 = sbr.rel (%p209_p12) target bundleno = 455 (0x1c7), region = 40  ;;  %s682_s6 = sshll.u32 (!%p209_p12), %s214_s30, 3 }
  0x29   : > { %s215_s7 = scalar_lea.sflag (!%p209_p12), [#allocation3], %s214_s30  ;;  %s218_s9 = scalar_lea.vmem (!%p209_p12), [#allocation2], %s682_s6 }
  0x2f   : > { %811 = dma.done.wait (%p899_p7), %s215_s7, 128  }
  0x30   : > { %813 = vsyncadd (%p899_p7), %s215_s7, 4294967168  ;;  %p247_p9 = scmp.lt.s32.totalorder %s882_s22, 1  ;;  %v259_v0 = vlaneseq  ;;  %vm284_vm0 = vcmask 122880   ;;  %v254_v4 = vld [vmem:[%s218_s9] sm:$0xff]  ;;  %vm265_vm1 = vcmask 130048   ;;  %vm362_vm2 = vcmask 1043456  }
  0x31   : > { %v256_v5 = vld [vmem:[%s1026_s2] sm:$0x1]  ;;  %v269_v7 = vmul.f32 %v254_v4, %v254_v4  ;;  %v684_v9 = vld [vmem:[%s1026_s2 + $0x1] ss:$0 sm:$0xff]  ;;  %v689_v18 = vld [vmem:[%s1028_s4 + $0x4] sm:$0xf] }
  0x32   : > { %s1039_s22 = smov (!%p247_p9, %s882_s22), 1  ;;  %v956_v1 = vshrl.u32 %v259_v0, 7  ;;  %v279_v15 = vmul.f32 %v684_v9, %v254_v4  ;;  %v831_v19 = vmov 0.0   ;;  %vm832_vm3 = vmmov 0   ;;  %v355_v20 = vld [vmem:[%s1028_s4] sm:$0xf] }
  0x33   : > { %s249_s10 = scalar_lea.vmem %s1024_s0, %s1039_s22  ;;  %v270_v13 = vsel %vm265_vm1, %v269_v7, 0.0  ;;  %706 = vmatprep.subr.mxu0 %v831_v19  ;;  %708 = vmatprep.mubr.msk.f32.mxu0 %vm832_vm3, %v831_v19  ;;  %v685_v32 = vld [vmem:[%s1027_s3] ss:$0 sm:$0xff]  ;;  %v686_v33 = vld [vmem:[%s1027_s3 + $0x1] ss:$0 sm:$0xff]  ;;  %vm358_vm5 = vcmask 31744  }
  0x34   : > { %v261_v2 = vsub.s32 0, %v956_v1  ;;  %v255_v3 = vld [vmem:[%s249_s10] sm:$0x1]  ;;  %v280_v17 = vsel %vm265_vm1, %v279_v15, 0.0  ;;  %707 = vmatpush3.msk.msra.mxu0 %vm362_vm2, %v689_v18  ;;  %711 = vmatprep.subr.mxu1 %v831_v19  ;;  %v687_v34 = vld [vmem:[%s1027_s3 + $0x2] ss:$0 sm:$0xff] }
  0x35   : > { %v283_v6 = vmul.f32 %v255_v3, %v255_v3  ;;  %v288_v12 = vmul.f32 %v256_v5, %v255_v3  ;;  %716 = vmatprep.subr.mxu0 %v831_v19  ;;  %713 = vmatprep.mubr.msk.f32.mxu1 %vm832_vm3, %v831_v19  ;;  %v688_v40 = vld [vmem:[%s1027_s3 + $0x3] ss:$0 sm:$0xff]  ;;  %v694_v44 = vld [vmem:[%s1028_s4 + $0x8] sm:$0xf]  ;;  %vm345_vm6 = vcmp.eq.s32.totalorder %v956_v1, 0  ;;  %vm350_vm7 = vcmp.eq.s32.totalorder %v956_v1, 7 }
  0x36   : > { %v262_v8 = vrot.slane %v255_v3, %v261_v2  ;;  %712 = vmatpush3.msk.msra.mxu1 %vm362_vm2, %v355_v20  ;;  %v697_v56 = vld [vmem:[%s1027_s3 + $0x4] ss:$0 sm:$0xff]  ;;  %s683_s27 = sshll.u32 %s1039_s22, 3 }
  0x37   : > { %v285_v10 = vsel %vm284_vm0, %v283_v6, 0.0  ;;  %v289_v16 = vsel %vm284_vm0, %v288_v12, 0.0  ;;  %s253_s13 = scalar_lea.vmem %s1029_s5, %s683_s27 }
  0x38   : > { %v264_v11 = vmul.f32 %v262_v8, %v254_v4  ;;  %286 = vadd.xlane.f32.xlu0 %v285_v10 }
  0x3a   : > { %v266_v14 = vsel %vm265_vm1, %v264_v11, 0.0 }
  0x3b   : > { %267 = vadd.xlane.f32.xlu1 %v266_v14 }
  0x3c   : > { %271 = vadd.xlane.f32.xlu0 %v270_v13 }
  0x3f   : > { %290 = vadd.xlane.f32.xlu1 %v289_v16 }
  0x40   : > { %281 = vadd.xlane.f32.xlu0 %v280_v17 }
  0xc5   : > { %v287_v21 = vpop.xlane.xlu0 %286 }
  0xc6   : > { %v300_v22 = vrot.slane %v287_v21, %v261_v2 }
  0xc8   : > { %v268_v25 = vpop.xlane.xlu1 %267 }
  0xc9   : > { %v272_v23 = vpop.xlane.xlu0 %271  ;;  %v323_v37 = vmul.f32 %v686_v33, %v268_v25 }
  0xca   : > { %v301_v24 = vmul.f32 %v300_v22, %v272_v23 }
  0xcc   : > { %v302_v26 = vmax.f32 %v301_v24, 1e-16  ;;  %v291_v27 = vpop.xlane.xlu1 %290 }
  0xcd   : > { %v295_v28 = vrot.slane %v291_v27, %v261_v2  ;;  %v282_v29 = vpop.xlane.xlu0 %281 }
  0xce   : > { %762 = vrsqrt.f32 %v302_v26 }
  0xcf   : > { %v296_v30 = vadd.f32 %v295_v28, %v282_v29 }
  0xd1   : > { %v331_v38 = vmul.f32 %v687_v34, %v296_v30 }
  0xd8   : > { %v763_v31 = vpop.eup %762 }
  0xd9   : > { %v304_v35 = vmul.f32 %v763_v31, %v268_v25 }
  0xdb   : > { %v316_v36 = vmul.f32 %v685_v32, %v304_v35 }
  0xdd   : > { %v324_v39 = vadd.f32 %v323_v37, %v316_v36 }
  0xdf   : > { %v332_v41 = vadd.f32 %v331_v38, %v324_v39 }
  0xe1   : > { %v339_v42 = vadd.f32 %v688_v40, %v332_v41 }
  0xe3   : > { %vm340_vm4 = vcmp.gt.f32.partialorder %v339_v42, 0.0  ;;  %v341_v43 = vmul.f32 0.1, %v339_v42 }
  0xe5   : > { %v342_v45 = vsel %vm340_vm4, %v339_v42, %v341_v43 }
  0xe6   : > { %v351_v46 = vrot.slane %v342_v45, 1  ;;  %709 = vmatmul.mubr.msk.f32.vlgmr.msra.gmra.mrb[0].mxu0 %vm358_vm5, %v342_v45  ;;  %v346_v47 = vrot.slane %v342_v45, 7 }
  0xe7   : > { %717 = vmatpush3.msk.msra.mxu0 %vm362_vm2, %v694_v44  ;;  %718 = vmatprep.mubr.msk.f32.mxu0 %vm832_vm3, %v831_v19 }
  0xe8   : > { %v349_v48 = vsel %vm345_vm6, 0.0, %v346_v47  ;;  %v354_v49 = vsel %vm350_vm7, 0.0, %v351_v46 }
  0xe9   : > { %714 = vmatmul.mubr.msk.f32.vlgmr.msra.gmra.mrb[0].mxu1 %vm358_vm5, %v349_v48 }
  0xea   : > { %719 = vmatmul.mubr.msk.f32.vlgmr.msra.gmra.mrb[2].mxu0 %vm358_vm5, %v354_v49 }
 0x1b9   : > { %v432_v50 = vpop.f32.mrb[0].mxu0 }
 0x1ba   : > { %v710_v51 = vpop.f32.mrb[1].mxu0 }
 0x1bc   : > { %v508_v52 = vpop.f32.mrb[0].mxu1 }
 0x1bd   : > { %v509_v53 = vadd.f32 %v508_v52, %v432_v50  ;;  %v715_v54 = vpop.f32.mrb[1].mxu1  ;;  %v586_v55 = vpop.f32.mrb[2].mxu0 }
 0x1be   : > { %v720_v57 = vpop.f32.mrb[3].mxu0 }
 0x1bf   : > { %v590_v58 = vadd.f32 %v586_v55, %v509_v53 }
 0x1c1   : > { %v597_v59 = vadd.f32 %v697_v56, %v590_v58 }
 0x1c3   : > { %vm598_vm8 = vcmp.gt.f32.partialorder %v597_v59, 0.0  ;;  %v599_v60 = vmul.f32 0.1, %v597_v59 }
 0x1c5   : > { %v600_v61 = vsel %vm598_vm8, %v597_v59, %v599_v60 }
 0x1c6   : > { %601 = vst.msk [vmem:[%s253_s13] sm:$0xff] %vm358_vm5, %v600_v61 }
 0x1c7 PF: > { %p15_p7 = scmp.ge.s32.totalorder %s885_s23, 4   ;;  %s1034_s18 = smov %s820_s19 }
 0x1c8   : > { %s1035_s19 = smov %s824_s20  ;;  %s1036_s20 = smov %s895_s26 }
 0x1c9   : > { %s1037_s21 = smov %s885_s23  ;;  %17 = sbr.rel (!%p15_p7) target bundleno = 3 (0x3), region = 85 }
 0x1d0   :  { %621 = vsyncpa [#allocation3], 1 }
 0x1d1   :  { %623 = vsyncpa [#allocation3 + $0x1], 1 }

</bundles_post_ra>
